<compile_context>
chip_gen: v5e
topology: v5e:2x2
jax: 0.10.0
libtpu: 0.0.40
codegen_flags: <defaults>
</compile_context>

<pallas_src>
import jax
import jax.numpy as jnp
from jax.experimental import pallas as pl
from jax.experimental.pallas import tpu as pltpu


def _resolve_view_size(total, size):
    """Resolve a torch-style view size tuple (supports a single -1)."""
    size = tuple(int(s) for s in size)
    if -1 in size:
        known = 1
        for s in size:
            if s != -1:
                known *= s
        assert known > 0 and total % known == 0, "invalid view size"
        size = tuple(total // known if s == -1 else s for s in size)
    prod = 1
    for s in size:
        prod *= s
    assert prod == total, "view size incompatible with number of elements"
    return size


def pallas_view(x, size):
    """torch.Tensor.view(size) for a contiguous input: metadata-only reshape.

    A contiguous view moves no data, so the fastest correct implementation on
    every TPU generation (v5e/v6e/v7x) is the plain reshape (bitcast).
    """
    out_shape = _resolve_view_size(int(x.size), size)
    return jnp.reshape(x, out_shape)


# ---------------------------------------------------------------------------
# Forced physical-copy path: one HBM->HBM DMA, no VMEM staging, no grid.
# ---------------------------------------------------------------------------
def _hbm_copy_kernel(x_ref, o_ref, sem):
    cp = pltpu.make_async_copy(x_ref, o_ref, sem)
    cp.start()
    cp.wait()


def pallas_view_copy(x, size):
    """Same semantics as pallas_view, but materializes a fresh output buffer
    via a single whole-array HBM->HBM DMA issued from a Pallas kernel."""
    total = int(x.size)
    out_shape = _resolve_view_size(total, size)
    dtype_bytes = jnp.dtype(x.dtype).itemsize

    copied = pl.pallas_call(
        _hbm_copy_kernel,
        out_shape=jax.ShapeDtypeStruct(x.shape, x.dtype),
        in_specs=[pl.BlockSpec(memory_space=pl.ANY)],
        out_specs=pl.BlockSpec(memory_space=pl.ANY),
        scratch_shapes=[pltpu.SemaphoreType.DMA(())],
        cost_estimate=pl.CostEstimate(
            flops=0,
            transcendentals=0,
            bytes_accessed=2 * total * dtype_bytes,
        ),
    )(x)

    # The reshape to the requested view size stays metadata-only.
    return jnp.reshape(copied, out_shape)


if __name__ == "__main__":
    key = jax.random.PRNGKey(0)
    # Small NCHW input consistent with a typical use of View (flatten before a
    # Linear layer): (2, 4, 16, 16) -> view to (2, -1) = (2, 1024).
    x = jax.random.normal(key, (2, 4, 16, 16), dtype=jnp.float32)
    view_size = (2, -1)

    # Reference semantics: torch .view == contiguous row-major reshape.
    ref = jax.block_until_ready(jnp.reshape(x, (2, 1024)))

    # Fast path (the actual View.forward equivalent): metadata-only reshape.
    out_fast = jax.block_until_ready(pallas_view(x, view_size))
    assert out_fast.shape == (2, 1024), out_fast.shape
    assert out_fast.dtype == x.dtype
    assert bool(jnp.array_equal(out_fast, ref))

    # Pallas kernel path (forced physical copy via one HBM->HBM DMA).
    out_copy = jax.block_until_ready(pallas_view_copy(x, view_size))
    assert out_copy.shape == (2, 1024), out_copy.shape
    assert out_copy.dtype == x.dtype
    assert bool(jnp.array_equal(out_copy, ref))

    print("KERNEL_OK")
</pallas_src>

<mosaic_0001>
module attributes {stable_mosaic.version = 11 : i64} {
  func.func @_hbm_copy_kernel(%arg0: memref<2x4x16x16xf32, #tpu.memory_space<any>>, %arg1: memref<2x4x16x16xf32, #tpu.memory_space<any>>, %arg2: memref<!tpu.dma_semaphore, #tpu.memory_space<semaphore_mem>>) attributes {dimension_semantics = [], scalar_prefetch = 0 : i64, scratch_operands = 1 : i64, tpu.core_type = #tpu.core_type<tc>} {
    tpu.enqueue_dma source(%arg0 : memref<2x4x16x16xf32, #tpu.memory_space<any>>) target(%arg1 : memref<2x4x16x16xf32, #tpu.memory_space<any>>) target_semaphore(%arg2 : memref<!tpu.dma_semaphore, #tpu.memory_space<semaphore_mem>>)
    tpu.wait_dma2 semaphore(%arg2 : memref<!tpu.dma_semaphore, #tpu.memory_space<semaphore_mem>>) src(%arg0 : memref<2x4x16x16xf32, #tpu.memory_space<any>>) dst(%arg1 : memref<2x4x16x16xf32, #tpu.memory_space<any>>)
    return
  }
}

</mosaic_0001>

<bundles_post_ra>
// kernel: tpu_custom_call.1
= control target key start
LH: loop header
LB: loop body
LE: loop exit
PB: predicated region body
PF: predicated region fallthrough
CT: control target
= control target key end

     0   :  { %s34_s12 = smov [#allocation2]   ;;  %s35_s13 = smov [#allocation3]   ;;  %s53_s0 = inlined_call_operand.hbm [shape: f32[2,4,16,16], index: 0, kind: input, shape index: {}]   ;;  %s54_s1 = inlined_call_operand.hbm [shape: f32[2,4,16,16], index: 1, kind: output, shape index: {}]  }
   0x1   :  { %s10_s8 = sshll.u32 %s53_s0, 4  ;;  %s12_s11 = sshll.u32 %s54_s1, 4  ;;  %s11_s8 = int_to_ptr.hbm [resolvable:$true] %s10_s8  ;;  %s13_s11 = int_to_ptr.hbm [resolvable:$true] %s12_s11 }
   0x2   :  { %s36_s14 = smov 0  }
   0x3   :  { %16 = dma.general %s11_s8, 2048, %s13_s11, %s34_s12, %s35_s13, [#allocation4], %s36_s14, 0  }
   0x4   :  { %32 = dma.done.wait [#allocation2], 2048 }
   0x5   :  { %33 = vsyncadd [#allocation2], 4294965248 }
   0x6   :  { %22 = vsyncmov [#allocation2] }
   0x9   :  { %s23_s15 = vpop.sfrf %22 }
   0xa   :  { %p28_p0 = scmp.ne.s32.totalorder %s23_s15, 0 }
   0xc   :  { %27 = shalt.err (%p28_p0)  }

</bundles_post_ra>
